<compile_context>
chip_gen: v5e
topology: v5e:2x2
jax: 0.10.0
libtpu: 0.0.40
codegen_flags: <defaults>
</compile_context>

<pallas_src>
import numpy as np
import jax
import jax.numpy as jnp
from jax.experimental import pallas as pl
from jax.experimental.pallas import tpu as pltpu

LN_EPS = 1e-5  # PyTorch nn.LayerNorm default eps


def _round_up(n, m):
    return ((n + m - 1) // m) * m


def _get_h_dim(input_dim, output_dim, hidden_dim):
    if hidden_dim != 0:
        return hidden_dim
    return int(np.round(2.0 ** (np.log2(input_dim) / 2.0 + np.log2(output_dim) / 2.0)))


# ----------------------------------------------------------------------------
# Fused TideBlock kernel
# ----------------------------------------------------------------------------
def tide_block_kernel(x_ref, win_ref, b1_ref, w2_ref, ob_ref, o_ref):
    """One row-tile of the TideBlock.

    x_ref  : [TM, din]              f32   (cast to bf16 in-kernel)
    win_ref: [din, H_pad + dout]    bf16  (zero-padded W1 | Wskip, lane-aligned split)
    b1_ref : [1, H_pad]             f32   (zero-padded)
    w2_ref : [H_pad, dout]          bf16  (zero-padded rows)
    ob_ref : [3, dout]              f32   rows: (b2 + b_skip, gamma, beta)
    o_ref  : [TM, dout]             bf16
    """
    h_pad = b1_ref.shape[-1]                       # lane-aligned split point (multiple of 128)
    x = x_ref[...].astype(jnp.bfloat16)            # in-kernel cast: no extra HBM pass for x
    # Single MXU matmul serves both the dense first layer and the skip projection.
    z = jnp.dot(x, win_ref[...], preferred_element_type=jnp.float32)
    hidden = jnp.maximum(z[:, :h_pad] + b1_ref[...], 0.0)       # ReLU (pad cols stay 0)
    skip = z[:, h_pad:]                                          # lane-aligned slice
    dense = jnp.dot(hidden.astype(w2_ref.dtype), w2_ref[...],
                    preferred_element_type=jnp.float32)
    # Dropout == identity (eval); b2 + b_skip were pre-folded into ob_ref[0].
    o = dense + skip + ob_ref[0:1, :]
    # LayerNorm over the feature axis, stats in f32 (matches nn.LayerNorm, biased var).
    mean = jnp.mean(o, axis=-1, keepdims=True)
    var = jnp.mean(jnp.square(o - mean), axis=-1, keepdims=True)
    o = (o - mean) * jax.lax.rsqrt(var + LN_EPS)
    o_ref[...] = (o * ob_ref[1:2, :] + ob_ref[2:3, :]).astype(o_ref.dtype)


# ----------------------------------------------------------------------------
# Wrapper
# ----------------------------------------------------------------------------
def tide_block_forward(params, x, *, tile_m=2048):
    """x: [batch, ts_len, input_dim] (f32) -> [batch, ts_len, output_dim] (bf16)."""
    b, ts_len, din = x.shape
    h_pad, dout = params["w2"].shape
    n = b * ts_len

    x2 = x.reshape(n, din)                      # layout-preserving, no HBM copy / no cast

    # Row tile: as large as possible to amortize per-grid-step overhead, but capped so the
    # grid keeps >= 2 steps (v7x megacore sharding) and stays a multiple of 8 sublanes.
    tm = max(8, min(tile_m, _round_up(pl.cdiv(n, 2), 8)))
    grid = (pl.cdiv(n, tm),)                    # partial last block handled by masked stores

    out = pl.pallas_call(
        tide_block_kernel,
        out_shape=jax.ShapeDtypeStruct((n, dout), jnp.bfloat16),
        grid=grid,
        in_specs=[
            pl.BlockSpec((tm, din), lambda i: (i, 0)),               # x: row-tiled, pipelined
            pl.BlockSpec((din, h_pad + dout), lambda i: (0, 0)),     # W1_pad|Wskip (resident)
            pl.BlockSpec((1, h_pad), lambda i: (0, 0)),              # b1_pad
            pl.BlockSpec((h_pad, dout), lambda i: (0, 0)),           # W2_pad
            pl.BlockSpec((3, dout), lambda i: (0, 0)),               # (b2+bs, gamma, beta)
        ],
        out_specs=pl.BlockSpec((tm, dout), lambda i: (i, 0)),
        compiler_params=pltpu.CompilerParams(
            dimension_semantics=("parallel",),   # independent row tiles -> v7x megacore
            vmem_limit_bytes=32 * 1024 * 1024,   # ample for these tiles; safe on v5e/v6e/v7x
        ),
    )(x2, params["w_in"], params["b1"], params["w2"], params["ob"])

    return out.reshape(b, ts_len, dout)


# ----------------------------------------------------------------------------
# Parameter construction (mirrors PyTorch TideBlock.__init__ shapes)
# ----------------------------------------------------------------------------
def _linear_init(key, din, dout):
    kw, kb = jax.random.split(key)
    bound = 1.0 / np.sqrt(din)
    w = jax.random.uniform(kw, (din, dout), jnp.float32, -bound, bound)
    b = jax.random.uniform(kb, (1, dout), jnp.float32, -bound, bound)
    return w, b


def make_tide_block_params(key, input_dim, output_dim, hidden_dim=0):
    h = _get_h_dim(input_dim, output_dim, hidden_dim)
    h_pad = _round_up(h, 128)                   # lane-aligned hidden width
    k1, k2, k3 = jax.random.split(key, 3)
    w1, b1 = _linear_init(k1, input_dim, h)
    w2, b2 = _linear_init(k2, h, output_dim)
    ws, bs = _linear_init(k3, input_dim, output_dim)
    gamma = jnp.ones((1, output_dim), jnp.float32)
    beta = jnp.zeros((1, output_dim), jnp.float32)

    # Zero-pad the hidden dimension so the fused-matmul split is a whole lane tile.
    w1_pad = jnp.pad(w1, ((0, 0), (0, h_pad - h)))
    b1_pad = jnp.pad(b1, ((0, 0), (0, h_pad - h)))
    w2_pad = jnp.pad(w2, ((0, h_pad - h), (0, 0)))

    packed = dict(
        w_in=jnp.concatenate([w1_pad, ws], axis=1).astype(jnp.bfloat16),  # [din, h_pad+dout]
        b1=b1_pad,                                                        # [1, h_pad]  f32
        w2=w2_pad.astype(jnp.bfloat16),                                   # [h_pad, dout]
        ob=jnp.concatenate([b2 + bs, gamma, beta], axis=0),               # [3, dout]   f32
    )
    raw = dict(w1=w1, b1=b1, w2=w2, b2=b2, ws=ws, bs=bs, gamma=gamma, beta=beta)
    return packed, raw


# ----------------------------------------------------------------------------
# References: exact kernel math (bf16 path) and pure-f32 PyTorch semantics
# ----------------------------------------------------------------------------
def tide_block_reference_kernel_path(params, x):
    b, ts_len, din = x.shape
    h_pad = params["b1"].shape[-1]
    x2 = x.reshape(b * ts_len, din).astype(jnp.bfloat16)
    z = jnp.dot(x2, params["w_in"], preferred_element_type=jnp.float32)
    hidden = jnp.maximum(z[:, :h_pad] + params["b1"], 0.0)
    dense = jnp.dot(hidden.astype(jnp.bfloat16), params["w2"],
                    preferred_element_type=jnp.float32)
    o = dense + z[:, h_pad:] + params["ob"][0:1, :]
    mean = jnp.mean(o, axis=-1, keepdims=True)
    var = jnp.mean(jnp.square(o - mean), axis=-1, keepdims=True)
    o = (o - mean) * jax.lax.rsqrt(var + LN_EPS)
    o = o * params["ob"][1:2, :] + params["ob"][2:3, :]
    return o.astype(jnp.bfloat16).reshape(b, ts_len, -1)


def tide_block_reference_f32(raw, x):
    """Matches the PyTorch module in full f32 (eval-mode dropout = identity)."""
    b, ts_len, din = x.shape
    x2 = x.reshape(b * ts_len, din)
    hidden = jnp.maximum(x2 @ raw["w1"] + raw["b1"], 0.0)
    dense = hidden @ raw["w2"] + raw["b2"]
    skip = x2 @ raw["ws"] + raw["bs"]
    o = dense + skip
    mean = jnp.mean(o, axis=-1, keepdims=True)
    var = jnp.mean(jnp.square(o - mean), axis=-1, keepdims=True)
    o = (o - mean) * jax.lax.rsqrt(var + LN_EPS)
    o = o * raw["gamma"] + raw["beta"]
    return o.reshape(b, ts_len, -1)


# ----------------------------------------------------------------------------
if __name__ == "__main__":
    # Small shapes consistent with TideBlock.forward: [batch, ts_len, input_dim]
    batch, ts_len = 2, 8
    input_dim, output_dim = 32, 16     # hidden auto-sized: round(sqrt(32*16)) = 23 -> pad 128

    key = jax.random.PRNGKey(0)
    k_param, k_x = jax.random.split(key)
    packed, raw = make_tide_block_params(k_param, input_dim, output_dim, hidden_dim=0)
    x = jax.random.normal(k_x, (batch, ts_len, input_dim), jnp.float32)

    fwd = jax.jit(lambda v: tide_block_forward(packed, v))
    out = fwd(x)
    jax.block_until_ready(out)
    assert out.shape == (batch, ts_len, output_dim), out.shape

    # Exact-path check (same bf16 operands / f32 accumulation as the kernel).
    ref_bf16 = tide_block_reference_kernel_path(packed, x)
    np.testing.assert_allclose(np.asarray(out, np.float32),
                               np.asarray(ref_bf16, np.float32),
                               atol=2e-2, rtol=2e-2)

    # Loose check against the pure-f32 PyTorch-equivalent math (bf16 matmul/output drift).
    ref_f32 = tide_block_reference_f32(raw, x)
    np.testing.assert_allclose(np.asarray(out, np.float32),
                               np.asarray(ref_f32),
                               atol=1e-1, rtol=1e-1)
    print("KERNEL_OK")
</pallas_src>

<mosaic_0001>
module attributes {stable_mosaic.version = 11 : i64} {
  func.func @tide_block_kernel(%arg0: i32, %arg1: memref<8x32xf32, #tpu.memory_space<vmem>>, %arg2: memref<32x144xbf16, #tpu.memory_space<vmem>>, %arg3: memref<1x128xf32, #tpu.memory_space<vmem>>, %arg4: memref<128x16xbf16, #tpu.memory_space<vmem>>, %arg5: memref<3x16xf32, #tpu.memory_space<vmem>>, %arg6: memref<8x16xbf16, #tpu.memory_space<vmem>>) attributes {dimension_semantics = [#tpu.dimension_semantics<parallel>], iteration_bounds = array<i64: 2>, scalar_prefetch = 0 : i64, scratch_operands = 0 : i64, tpu.core_type = #tpu.core_type<tc>, window_params = [{transform_indices = @transform_0, window_bounds = array<i64: 8, 32>}, {pipeline_mode = #tpu.pipeline_mode<synchronous>, transform_indices = @transform_1, window_bounds = array<i64: 32, 144>}, {pipeline_mode = #tpu.pipeline_mode<synchronous>, transform_indices = @transform_2, window_bounds = array<i64: 1, 128>}, {pipeline_mode = #tpu.pipeline_mode<synchronous>, transform_indices = @transform_3, window_bounds = array<i64: 128, 16>}, {pipeline_mode = #tpu.pipeline_mode<synchronous>, transform_indices = @transform_4, window_bounds = array<i64: 3, 16>}, {transform_indices = @transform_5, window_bounds = array<i64: 8, 16>}]} {
    %c0 = arith.constant 0 : index
    %c0_0 = arith.constant 0 : index
    %0 = vector.load %arg1[%c0, %c0_0] : memref<8x32xf32, #tpu.memory_space<vmem>>, vector<8x32xf32>
    %1 = arith.truncf %0 : vector<8x32xf32> to vector<8x32xbf16>
    %c0_1 = arith.constant 0 : index
    %c0_2 = arith.constant 0 : index
    %2 = vector.load %arg2[%c0_1, %c0_2] : memref<32x144xbf16, #tpu.memory_space<vmem>>, vector<32x144xbf16>
    %cst = arith.constant dense<0.000000e+00> : vector<8x144xf32>
    %3 = tpu.matmul %1, %2, %cst {dimension_numbers = #tpu.dot_dimension_numbers<[1], [0], [0], [1], [0, 0, 1, 1], [], []>} : vector<8x32xbf16>, vector<32x144xbf16>, vector<8x144xf32> -> vector<8x144xf32>
    %4 = vector.extract_strided_slice %3 {offsets = [0, 0], sizes = [8, 128], strides = [1, 1]} : vector<8x144xf32> to vector<8x128xf32>
    %c0_3 = arith.constant 0 : index
    %c0_4 = arith.constant 0 : index
    %5 = vector.load %arg3[%c0_3, %c0_4] : memref<1x128xf32, #tpu.memory_space<vmem>>, vector<1x128xf32>
    %6 = vector.broadcast %5 : vector<1x128xf32> to vector<8x128xf32>
    %7 = arith.addf %4, %6 : vector<8x128xf32>
    %cst_5 = arith.constant 0.000000e+00 : f32
    %8 = vector.broadcast %cst_5 : f32 to vector<8x128xf32>
    %9 = arith.maximumf %7, %8 : vector<8x128xf32>
    %10 = vector.extract_strided_slice %3 {offsets = [0, 128], sizes = [8, 16], strides = [1, 1]} : vector<8x144xf32> to vector<8x16xf32>
    %11 = arith.truncf %9 : vector<8x128xf32> to vector<8x128xbf16>
    %c0_6 = arith.constant 0 : index
    %c0_7 = arith.constant 0 : index
    %12 = vector.load %arg4[%c0_6, %c0_7] : memref<128x16xbf16, #tpu.memory_space<vmem>>, vector<128x16xbf16>
    %cst_8 = arith.constant dense<0.000000e+00> : vector<8x16xf32>
    %13 = tpu.matmul %11, %12, %cst_8 {dimension_numbers = #tpu.dot_dimension_numbers<[1], [0], [0], [1], [0, 0, 1, 1], [], []>} : vector<8x128xbf16>, vector<128x16xbf16>, vector<8x16xf32> -> vector<8x16xf32>
    %14 = arith.addf %13, %10 : vector<8x16xf32>
    %c0_9 = arith.constant 0 : index
    %c0_10 = arith.constant 0 : index
    %15 = vector.load %arg5[%c0_9, %c0_10] : memref<3x16xf32, #tpu.memory_space<vmem>>, vector<1x16xf32>
    %16 = vector.broadcast %15 : vector<1x16xf32> to vector<8x16xf32>
    %17 = arith.addf %14, %16 : vector<8x16xf32>
    %cst_11 = arith.constant dense<0.000000e+00> : vector<8xf32>
    %18 = vector.multi_reduction <add>, %17, %cst_11 [1] : vector<8x16xf32> to vector<8xf32>
    %19 = vector.shape_cast %18 : vector<8xf32> to vector<8x1xf32>
    %cst_12 = arith.constant 1.600000e+01 : f32
    %20 = vector.broadcast %cst_12 : f32 to vector<8x1xf32>
    %21 = arith.divf %19, %20 : vector<8x1xf32>
    %22 = vector.broadcast %21 : vector<8x1xf32> to vector<8x16xf32>
    %23 = arith.subf %17, %22 : vector<8x16xf32>
    %24 = arith.mulf %23, %23 : vector<8x16xf32>
    %cst_13 = arith.constant dense<0.000000e+00> : vector<8xf32>
    %25 = vector.multi_reduction <add>, %24, %cst_13 [1] : vector<8x16xf32> to vector<8xf32>
    %26 = vector.shape_cast %25 : vector<8xf32> to vector<8x1xf32>
    %cst_14 = arith.constant 1.600000e+01 : f32
    %27 = vector.broadcast %cst_14 : f32 to vector<8x1xf32>
    %28 = arith.divf %26, %27 : vector<8x1xf32>
    %29 = vector.broadcast %21 : vector<8x1xf32> to vector<8x16xf32>
    %30 = arith.subf %17, %29 : vector<8x16xf32>
    %cst_15 = arith.constant 9.99999974E-6 : f32
    %31 = vector.broadcast %cst_15 : f32 to vector<8x1xf32>
    %32 = arith.addf %28, %31 : vector<8x1xf32>
    %33 = math.rsqrt %32 : vector<8x1xf32>
    %34 = vector.broadcast %33 : vector<8x1xf32> to vector<8x16xf32>
    %35 = arith.mulf %30, %34 : vector<8x16xf32>
    %c1 = arith.constant 1 : index
    %c0_16 = arith.constant 0 : index
    %36 = vector.load %arg5[%c1, %c0_16] : memref<3x16xf32, #tpu.memory_space<vmem>>, vector<1x16xf32>
    %37 = vector.broadcast %36 : vector<1x16xf32> to vector<8x16xf32>
    %38 = arith.mulf %35, %37 : vector<8x16xf32>
    %c2 = arith.constant 2 : index
    %c0_17 = arith.constant 0 : index
    %39 = vector.load %arg5[%c2, %c0_17] : memref<3x16xf32, #tpu.memory_space<vmem>>, vector<1x16xf32>
    %40 = vector.broadcast %39 : vector<1x16xf32> to vector<8x16xf32>
    %41 = arith.addf %38, %40 : vector<8x16xf32>
    %42 = arith.truncf %41 : vector<8x16xf32> to vector<8x16xbf16>
    %c0_18 = arith.constant 0 : index
    %c0_19 = arith.constant 0 : index
    %43 = vector.load %arg6[%c0_18, %c0_19] : memref<8x16xbf16, #tpu.memory_space<vmem>>, vector<8x16xbf16>
    tpu.vector_store %arg6[%c0_18, %c0_19], %42 {strides = array<i32>} : memref<8x16xbf16, #tpu.memory_space<vmem>>, vector<8x16xbf16>,
    return
  }
  func.func @transform_0(%arg0: i32) -> (i32, i32) {
    %c0_i32 = arith.constant 0 : i32
    %c0_i32_0 = arith.constant 0 : i32
    return %arg0, %c0_i32 : i32, i32
  }
  func.func @transform_1(%arg0: i32) -> (i32, i32) {
    %c0_i32 = arith.constant 0 : i32
    %c0_i32_0 = arith.constant 0 : i32
    %c0_i32_1 = arith.constant 0 : i32
    return %c0_i32, %c0_i32_0 : i32, i32
  }
  func.func @transform_2(%arg0: i32) -> (i32, i32) {
    %c0_i32 = arith.constant 0 : i32
    %c0_i32_0 = arith.constant 0 : i32
    %c0_i32_1 = arith.constant 0 : i32
    return %c0_i32, %c0_i32_0 : i32, i32
  }
  func.func @transform_3(%arg0: i32) -> (i32, i32) {
    %c0_i32 = arith.constant 0 : i32
    %c0_i32_0 = arith.constant 0 : i32
    %c0_i32_1 = arith.constant 0 : i32
    return %c0_i32, %c0_i32_0 : i32, i32
  }
  func.func @transform_4(%arg0: i32) -> (i32, i32) {
    %c0_i32 = arith.constant 0 : i32
    %c0_i32_0 = arith.constant 0 : i32
    %c0_i32_1 = arith.constant 0 : i32
    return %c0_i32, %c0_i32_0 : i32, i32
  }
  func.func @transform_5(%arg0: i32) -> (i32, i32) {
    %c0_i32 = arith.constant 0 : i32
    %c0_i32_0 = arith.constant 0 : i32
    return %arg0, %c0_i32 : i32, i32
  }
}

</mosaic_0001>

<bundles_post_ra>
// kernel: _lambda_.1
= control target key start
LH: loop header
LB: loop body
LE: loop exit
PB: predicated region body
PF: predicated region fallthrough
CT: control target
= control target key end

     0   :  { %10 = vsyncpa [#allocation3], 0  ;;  %s1162_s0 = inlined_call_operand.hbm [shape: f32[16,32], index: 0, kind: input, shape index: {}]   ;;  %s1163_s1 = inlined_call_operand.hbm [shape: bf16[32,144], index: 1, kind: input, shape index: {}]   ;;  %s1164_s2 = inlined_call_operand.hbm [shape: f32[1,128], index: 2, kind: input, shape index: {}]   ;;  %s1165_s3 = inlined_call_operand.hbm [shape: bf16[128,16], index: 3, kind: input, shape index: {}]   ;;  %s1166_s4 = inlined_call_operand.vmem [shape: f32[3,16], index: 4, kind: input, shape index: {}]   ;;  %s1167_s5 = inlined_call_operand.hbm [shape: bf16[16,16], index: 5, kind: output, shape index: {}]  }
   0x1   :  { %12 = vsyncpa [#allocation3 + $0x1], 0 }
   0x2   :  { %13 = vsyncpa [#allocation6], 0 }
   0x3   :  { %14 = vsyncpa [#allocation9], 0 }
   0x4   :  { %15 = vsyncpa [#allocation4], 0 }
   0x5   :  { %17 = vsyncpa [#allocation4 + $0x1], 0  ;;  %s992_s18 = smov 0   ;;  %s994_s19 = smov 0  }
   0x6   :  { %s996_s20 = smov 0   ;;  %s998_s21 = smov 0  }
   0x7 LB: > { %s175_s24 = sshll.u32 %s1163_s1, 4  ;;  %s1016_s25 = sadd.s32 4294967295, %s952_s21   ;;  %s952_s21 = sphi %s998_s21, %s1178_s21   ;;  %s948_s20 = sphi %s996_s20, %s1177_s20   ;;  %s944_s19 = sphi %s994_s19, %s1176_s19   ;;  %s940_s18 = sphi %s992_s18, %s1175_s18   ;;  %s176_s24 = int_to_ptr.hbm [resolvable:$true] %s175_s24 }
   0x8   : > { %p589_p0 = scmp.ge.s32.totalorder %s952_s21, 1  ;;  %p44_p1 = scmp.eq.s32.totalorder %s1016_s25, 0 }
   0x9   : > { %p164_p2 = scmp.lt.s32.totalorder %s952_s21, 3  ;;  %s954_s27 = smov [#allocation5]  }
   0xa   : > { %s177_s28 = sshll.u32 %s954_s27, 4  ;;  %s190_s6 = sshll.u32 %s1164_s2, 4  ;;  %s178_s28 = int_to_ptr.vmem [resolvable:$true] %s177_s28  ;;  %s191_s6 = int_to_ptr.hbm [resolvable:$true] %s190_s6 }
   0xb   : > { %p1021_p3 = pnand %p589_p0, %p164_p2  ;;  %s201_s10 = sshll.u32 %s1165_s3, 4  ;;  %s202_s10 = int_to_ptr.hbm [resolvable:$true] %s201_s10 }
   0xc   : > { %s955_s11 = smov [#allocation7]   ;;  %s956_s13 = smov 128  }
   0xd   : > { %p684_p4 = pneg %p1021_p3  ;;  %s192_s12 = sshll.u32 %s955_s11, 4  ;;  %s193_s12 = int_to_ptr.vmem [resolvable:$true] %s192_s12 }
   0xe   : > { %s957_s14 = smov 8   ;;  %s958_s15 = smov [#allocation8]  }
   0xf   : > { %p1033_p6 = pnand %p684_p4, %p44_p1  ;;  %s203_s16 = sshll.u32 %s958_s15, 4  ;;  %s204_s16 = int_to_ptr.vmem [resolvable:$true] %s203_s16 }
  0x10   : > { %s959_s17 = smov 64   ;;  %s960_s22 = smov 4  }
  0x11   : > { %687 = dma.hbm_to_vmem [thread:$0]  (!%p1033_p6), %s176_s24, 512, %s178_s28, [#allocation6], %s956_s13, %s956_s13, %s957_s14  }
  0x12   : > { %690 = dma.hbm_to_vmem [thread:$0]  (!%p1033_p6), %s191_s6, 16, %s193_s12, [#allocation6]  }
  0x13   : > { %693 = dma.hbm_to_vmem [thread:$0]  (!%p1033_p6), %s202_s10, 1024, %s204_s16, [#allocation9], %s959_s17, %s959_s17, %s960_s22  }
  0x14   : > { %s588_s23 = sadd.s32 4294967294, %s952_s21   ;;  %s1048_s24 = sadd.s32 1, %s952_s21  }
  0x15   : > { %s30_s27 = sadd.s32 1, %s948_s20  ;;  %s27_s28 = ssub.s32 %s952_s21, %s1048_s24 }
  0x16   : > { %p37_p7 = scmp.ne.s32.totalorder %s948_s20, %s944_s19  ;;  %p28_p8 = scmp.eq.s32.totalorder %s27_s28, 0 }
  0x17   : > { %p38_p9 = scmp.eq.s32.totalorder %s952_s21, 0  ;;  %p43_p10 = scmp.ne.s32.totalorder %s944_s19, %s940_s18 }
  0x18   : > { %p151_p11 = scmp.eq.s32.totalorder %s1016_s25, 1  ;;  %p157_p0 = scmp.eq.s32.totalorder %s588_s23, 1 }
  0x19   : > { %s1060_s29 = scalar_select %p28_p8, %s948_s20, %s30_s27  }
  0x1a   : > { %p1064_p12 = por %p44_p1, %p43_p10  ;;  %p1068_p13 = por %p151_p11, %p37_p7 }
  0x1b   : > { %p39_p2 = por %p38_p9, %p37_p7  ;;  %s220_s7 = sand.u32 1, %s948_s20  }
  0x1c   : > { %p1073_p4 = por %p157_p0, %p43_p10  ;;  %p705_p6 = scmp.lt.s32.totalorder %s952_s21, 2 }
  0x1d   : > { %s594_s9 = sshll.u32 %s220_s7, 3  ;;  %s595_s10 = sshll.u32 %s952_s21, 3 }
  0x1e   : > { %s228_s13 = scalar_lea.hbm %s1162_s0, %s595_s10  ;;  %s224_s15 = scalar_lea.vmem [#allocation2], %s594_s9 }
  0x1f   : > { %s230_s14 = sshll.u32 %s228_s13, 4  ;;  %s232_s16 = sshll.u32 %s224_s15, 4  ;;  %s231_s14 = int_to_ptr.hbm [resolvable:$true] %s230_s14  ;;  %s233_s16 = int_to_ptr.vmem [resolvable:$true] %s232_s16 }
  0x20   : > { %p1082_p8 = pnand %p705_p6, %p39_p2  ;;  %s221_s22 = scalar_lea.sflag [#allocation3], %s220_s7 }
  0x21   : > { %s848_s23 = sshra.s32 %s231_s14, 4  ;;  %s855_s9 = scalar_lea.hbm %s1162_s0, 16  ;;  %s849_s23 = int_to_ptr.hbm [resolvable:$true] %s848_s23 }
  0x22   : > { %s850_s27 = scalar_lea.hbm %s849_s23, 8  ;;  %p852_p9 = pneg %p1082_p8 }
  0x23   : > { %p851_p7 = scmp.ne.s32.totalorder %s849_s23, %s850_s27  ;;  %p856_p0 = scmp.lt.s32.totalorder %s849_s23, %s1162_s0 }
  0x24   : > { %p857_p2 = scmp.lt.s32.totalorder %s855_s9, %s850_s27 }
  0x25   : > { %p853_p10 = pnand %p852_p9, %p851_p7 }
  0x26   : > { %p858_p6 = por %p857_p2, %p856_p0 }
  0x27   : > { %p854_p11 = pneg %p853_p10 }
  0x29   : > { %p859_p5 = pnand %p858_p6, %p854_p11 }
  0x2b   : > { %862 = shalt.err (!%p859_p5)
}
  0x2c   : > { %697 = dma.hbm_to_vmem [thread:$0]  (!%p1082_p8), %s231_s14, 128, %s233_s16, %s221_s22  }
  0x2d   : > { %241 = sbr.rel (%p1021_p3) target bundleno = 606 (0x25e), region = 40  ;;  %s1099_s7 = sand.u32 (!%p1021_p3), 1, %s944_s19  }
  0x2e   : > { %s597_s13 = sshll.u32 (!%p1021_p3), %s1099_s7, 3  ;;  %s244_s15 = scalar_lea.sflag (!%p1021_p3), [#allocation3], %s1099_s7 }
  0x2f   : > { %s247_s28 = scalar_lea.vmem (!%p1021_p3), [#allocation2], %s597_s13 }
  0x32   : > { %923 = dma.done.wait (%p1064_p12), %s244_s15, 128  }
  0x33   : > { %925 = vsyncadd (%p1064_p12), %s244_s15, 4294967168 }
  0x34   : > { %927 = dma.done.wait (%p44_p1), [#allocation6], 528  }
  0x35   : > { %929 = vsyncadd (%p44_p1), [#allocation6], 4294966768 }
  0x36   : > { %931 = dma.done.wait (%p44_p1), [#allocation9], 1024  }
  0x37   : > { %933 = vsyncadd (%p44_p1), [#allocation9], 4294966272  ;;  %v612_v0 = vld [vmem:[#allocation5 + $0x10] sm:$0xf]  ;;  %v659_v1 = vld [vmem:[#allocation5 + $0x14] sm:$0xf0] }
  0x38   : > { %v604_v2 = vld [vmem:[#allocation5] sm:$0xf]  ;;  %v613_v3 = vor.u32 %v659_v1, %v612_v0  ;;  %v657_v4 = vld [vmem:[#allocation5 + $0x4] sm:$0xf0]  ;;  %v291_v7 = vld [vmem:[%s247_s28] sm:$0xff]  ;;  %vm317_vm0 = vcmask 261120  }
  0x39   : > { %v667_v5 = vld [vmem:[#allocation8 + $0x38] sm:$0xff]  ;;  %v605_v6 = vor.u32 %v657_v4, %v604_v2  ;;  %v666_v8 = vld [vmem:[#allocation8 + $0x30] sm:$0xff]  ;;  %v292_v12 = vpack.c.bf16 %v291_v7, %v291_v7  ;;  %v665_v13 = vld [vmem:[#allocation8 + $0x28] sm:$0xff]  ;;  %vm434_vm1 = vcmask 130048   ;;  %v961_v36 = vmov 16.0   ;;  %s601_s14 = sshll.u32 %s1099_s7, 2 }
  0x3a   : > { %327 = vmatpush.bf16.msra.mxu0 %v613_v3  ;;  %418 = vmatpush.bf16.msra.mxu2 %v667_v5  ;;  %v658_v9 = vld [vmem:[#allocation5 + $0x14] sm:$0xf]  ;;  %v614_v10 = vld [vmem:[#allocation5 + $0x18] sm:$0xf0]  ;;  %v664_v14 = vld [vmem:[#allocation8 + $0x20] sm:$0xff]  ;;  %754 = vrcp.f32 %v961_v36  ;;  %s653_s16 = sshll.u32 %s1016_s25, 2 }
  0x3b   : > { %v617_v11 = vor.u32 %v658_v9, %v614_v10  ;;  %v663_v15 = vld [vmem:[#allocation8 + $0x18] sm:$0xff]  ;;  %v662_v16 = vld [vmem:[#allocation8 + $0x10] sm:$0xff]  ;;  %v661_v17 = vld [vmem:[#allocation8 + $0x8] sm:$0xff]  ;;  %s484_s11 = scalar_lea.hbm %s1167_s5, %s653_s16  ;;  %s289_s12 = scalar_lea.vmem [#allocation10], %s601_s14  ;;  %vm471_vm6 = vcmask 125952  }
  0x3c   : > { %v656_v18 = vld [vmem:[#allocation5 + $0x4] sm:$0xf]  ;;  %v606_v19 = vld [vmem:[#allocation5 + $0x8] sm:$0xf0]  ;;  %v750_v22 = vld [vmem:[#allocation7] ss:$0 sm:$0xff] }
  0x3d   : > { %340 = vmatpush.bf16.msra.mxu1 %v617_v11  ;;  %v609_v20 = vor.u32 %v656_v18, %v606_v19  ;;  %v660_v21 = vld [vmem:[#allocation8] sm:$0xff]  ;;  %v751_v30 = vld [vmem:[%s1166_s4] ss:$0 sm:$0xff]  ;;  %v752_v57 = vld [vmem:[%s1166_s4 + $0x1] ss:$0 sm:$0xff]  ;;  %s486_s25 = sshll.u32 %s289_s12, 4  ;;  %s487_s25 = int_to_ptr.vmem [resolvable:$true] %s486_s25 }
  0x3e   : > { %328 = vmatpush.bf16.msra.mxu0 %v605_v6  ;;  %419 = vmatpush.bf16.msra.mxu2 %v666_v8  ;;  %v753_v59 = vld [vmem:[%s1166_s4 + $0x2] ss:$0 sm:$0xff]  ;;  %s488_s13 = sshll.u32 %s484_s11, 4  ;;  %s474_s15 = scalar_lea.sflag [#allocation4], %s1099_s7  ;;  %s489_s13 = int_to_ptr.hbm [resolvable:$true] %s488_s13 }
  0x3f   : > { %s892_s28 = sshra.s32 %s489_s13, 4  ;;  %s898_s14 = scalar_lea.hbm %s1167_s5, 8  ;;  %s893_s28 = int_to_ptr.hbm [resolvable:$true] %s892_s28 }
  0x40   : > { %v755_v37 = vpop.eup %754  ;;  %s894_s26 = scalar_lea.hbm %s893_s28, 4  ;;  %p899_p12 = scmp.lt.s32.totalorder %s893_s28, %s1167_s5 }
  0x41   : > { %618 = vmatmul.msk.bf16.vlgmr.msra.gmra.mxu0 %vm317_vm0, %v292_v12  ;;  %341 = vmatpush.bf16.msra.mxu1 %v609_v20  ;;  %v439_v38 = vmul.f32 16.0, %v755_v37  ;;  %vm443_vm2 = vweird.f32 %v755_v37  ;;  %p895_p1 = scmp.ne.s32.totalorder %s893_s28, %s894_s26  ;;  %p900_p8 = scmp.lt.s32.totalorder %s898_s14, %s894_s26 }
  0x42   : > { %420 = vmatpush.bf16.msra.mxu2 %v665_v13 }
  0x43   : > { %v440_v39 = vsub.f32 1.0, %v439_v38  ;;  %p896_p3 = pnand %p895_p1, %p1068_p13  ;;  %p901_p7 = por %p900_p8, %p899_p12 }
  0x44   : > { %619 = vmatmul.msk.bf16.vlgmr.msra.gmra.mxu1 %vm317_vm0, %v292_v12 }
  0x45   : > { %v441_v40 = vmul.f32 %v755_v37, %v440_v39  ;;  %p897_p5 = pneg %p896_p3 }
  0x46   : > { %421 = vmatpush.bf16.msra.mxu2 %v664_v14 }
  0x47   : > { %v442_v41 = vadd.f32 %v755_v37, %v441_v40  ;;  %p902_p9 = pnand %p901_p7, %p897_p5 }
  0x49   : > { %v444_v42 = vsel %vm443_vm2, %v755_v37, %v442_v41 }
  0x4a   : > { %422 = vmatpush.bf16.msra.mxu2 %v663_v15 }
  0x4e   : > { %423 = vmatpush.bf16.msra.mxu2 %v662_v16 }
  0x52   : > { %424 = vmatpush.bf16.msra.mxu2 %v661_v17 }
  0x56   : > { %425 = vmatpush.bf16.msra.mxu2 %v660_v21 }
  0xbe   : > { %v330_v23 = vpop.f32.mrf.mxu0 }
  0xbf   : > { %v351_v24 = vadd.f32 %v750_v22, %v330_v23 }
  0xc1   : > { %v352_v25 = vmax.f32 %v351_v24, 0.0  ;;  %v343_v28 = vpop.f32.mrf.mxu1 }
  0xc3   : > { %v353_v26 = vpack.c.bf16 %v352_v25, %v352_v25 }
  0xc5   : > { %426 = vmatmul.bf16.vlgmr.msra.gmra.mxu2 %v353_v26 }
  0xc6   : > { %v332_v27 = vpop.f32.mrf.mxu0 }
  0xc9   : > { %v345_v29 = vpop.f32.mrf.mxu1 }
 0x148   : > { %v427_v31 = vpop.f32.mrf.mxu2 }
 0x149   : > { %v428_v32 = vadd.f32 %v427_v31, %v343_v28 }
 0x14b   : > { %v433_v33 = vadd.f32 %v751_v30, %v428_v32 }
 0x14d   : > { %v435_v34 = vsel %vm434_vm1, %v433_v33, 0.0 }
 0x14e   : > { %436 = vadd.xlane.f32.xlu0 %v435_v34 }
 0x150   : > { %v429_v35 = vpop.f32.mrf.mxu2 }
 0x1c1   : > { %v437_v43 = vpop.xlane.xlu0 %436 }
 0x1c2   : > { %v445_v44 = vmul.f32 %v444_v42, %v437_v43 }
 0x1c4   : > { %v446_v45 = vsub.f32 %v433_v33, %v445_v44 }
 0x1c6   : > { %v447_v46 = vmul.f32 %v446_v45, %v446_v45 }
 0x1c8   : > { %v448_v47 = vsel %vm434_vm1, %v447_v46, 0.0 }
 0x1c9   : > { %449 = vadd.xlane.f32.xlu0 %v448_v47 }
 0x23c   : > { %v450_v48 = vpop.xlane.xlu0 %449 }
 0x23d   : > { %v451_v49 = vmul.f32 %v450_v48, %v444_v42 }
 0x23f   : > { %v452_v50 = vadd.f32 1e-05, %v451_v49 }
 0x241   : > { %756 = vrsqrt.f32 %v452_v50  ;;  %vm459_vm4 = vweird.f32 %v452_v50 }
 0x247   : > { %v757_v51 = vpop.eup %756 }
 0x248   : > { %v454_v52 = vmul.f32 %v757_v51, %v452_v50  ;;  %vm460_vm3 = vweird.f32 %v757_v51 }
 0x249   : > { %vm461_vm5 = vmor %vm459_vm4, %vm460_vm3 }
 0x24a   : > { %v455_v53 = vmul.f32 %v757_v51, %v454_v52 }
 0x24c   : > { %v456_v54 = vmul.f32 0.5, %v455_v53 }
 0x24e   : > { %v457_v55 = vsub.f32 1.5, %v456_v54 }
 0x250   : > { %v458_v56 = vmul.f32 %v757_v51, %v457_v55 }
 0x252   : > { %v462_v58 = vsel %vm461_vm5, %v757_v51, %v458_v56 }
 0x253   : > { %v463_v60 = vmul.f32 %v462_v58, %v446_v45 }
 0x255   : > { %v466_v61 = vmul.f32 %v752_v57, %v463_v60 }
 0x257   : > { %v469_v62 = vadd.f32 %v753_v59, %v466_v61 }
 0x259   : > { %v470_v63 = vpack.c.bf16 %v469_v62, %v469_v62 }
 0x25b   : > { %472 = vst.msk [vmem:[%s289_s12] sm:$0xf] %vm471_vm6, %v470_v63 }
 0x25c   : > { %905 = shalt.err (!%p902_p9)
}
 0x25d   : > { %682 = dma.vmem_to_hbm [thread:$0]  (%p1068_p13), %s487_s25, 64, %s489_s13, %s474_s15  }
 0x25e PF: > { %s500_s7 = sand.u32 1, %s940_s18   ;;  %p1174_p10 = scmp.ge.s32.totalorder %s952_s21, 2 }
 0x25f   : > { %s501_s23 = scalar_lea.sflag [#allocation4], %s500_s7 }
 0x260   : > { %p699_p11 = pnand %p1174_p10, %p1073_p4 }
 0x262   : > { %p700_p0 = pneg %p699_p11 }
 0x264   : > { %935 = dma.done.wait (%p700_p0), %s501_s23, 64  }
 0x265   : > { %937 = vsyncadd (%p700_p0), %s501_s23, 4294967232  ;;  %p20_p2 = scmp.ge.s32.totalorder %s1048_s24, 4   ;;  %s1175_s18 = smov %s944_s19 }
 0x266   : > { %s1176_s19 = smov %s948_s20  ;;  %s1177_s20 = smov %s1060_s29 }
 0x267   : > { %s1178_s21 = smov %s1048_s24  ;;  %22 = sbr.rel (!%p20_p2) target bundleno = 7 (0x7), region = 97 }
 0x26c   :  { %507 = vsyncpa [#allocation3], 1 }
 0x26d   :  { %509 = vsyncpa [#allocation3 + $0x1], 1 }
 0x26e   :  { %510 = vsyncpa [#allocation6], 1 }
 0x26f   :  { %511 = vsyncpa [#allocation9], 1 }
 0x270   :  { %512 = vsyncpa [#allocation4], 1 }
 0x271   :  { %514 = vsyncpa [#allocation4 + $0x1], 1 }

</bundles_post_ra>
